<compile_context>
chip_gen: v5e
topology: v5e:2x2
jax: 0.10.0
libtpu: 0.0.40
codegen_flags: <defaults>
</compile_context>

<pallas_src>
import jax
import jax.numpy as jnp
from jax.experimental import pallas as pl
from jax.experimental.pallas import tpu as pltpu


LN_EPS = 1e-5  # torch.nn.LayerNorm default


def _round_up(x, m):
    return ((x + m - 1) // m) * m


def _mlp_chunk_kernel(x_ref, w1_ref, bgb_ref, w2_ref, b2_ref, o_ref):
    """Fused Linear -> LayerNorm -> SiLU -> Linear on one row tile.

    x_ref:   (TM, Din)    x.dtype (f32 in the example) — cast to bf16 in-kernel
    w1_ref:  (Din, H)     bf16   (resident across grid steps)
    bgb_ref: (3, H)       f32    rows = [b1, ln_gamma, ln_beta]
    w2_ref:  (H, Dout)    bf16   (resident across grid steps)
    b2_ref:  (1, Dout)    f32
    o_ref:   (TM, Dout)   out dtype (unpadded; masked vst accepted)
    """
    # ---- Linear 1: cast x tile on the VPU, bf16 operands, f32 acc on MXU ----
    x = x_ref[...].astype(jnp.bfloat16)
    h = jnp.dot(x, w1_ref[...], preferred_element_type=jnp.float32)
    h = h + bgb_ref[0:1, :]                                   # bias (f32)

    # ---- LayerNorm over hidden dim: two-pass (numerically stable) stats ----
    inv_h = jnp.float32(1.0 / h.shape[-1])
    mu = jnp.sum(h, axis=-1, keepdims=True) * inv_h
    d = h - mu
    var = jnp.sum(d * d, axis=-1, keepdims=True) * inv_h
    hn = d * jax.lax.rsqrt(var + LN_EPS)                      # rsqrt -> EUP
    hn = hn * bgb_ref[1:2, :] + bgb_ref[2:3, :]

    # ---- SiLU (sigmoid on the EUP) ----
    a = hn * jax.nn.sigmoid(hn)

    # ---- Linear 2: bf16 operands, f32 accumulation on the MXU ----
    out = jnp.dot(a.astype(jnp.bfloat16), w2_ref[...],
                  preferred_element_type=jnp.float32)
    out = out + b2_ref[...]
    o_ref[...] = out.astype(o_ref.dtype)


def mlp_chunk_act_encoder(x, params, act_chunk_len, *, row_tile=1024,
                          dimension_semantics=("parallel",)):
    """x: (B, T*Tc, Da)  ->  (B, T, latent_dim).

    On v7x pass dimension_semantics=(pltpu.CORE_PARALLEL,) to shard rows
    across both TensorCores (weights are tiny, so each core keeping its own
    resident copy has no VMEM downside).
    """
    B, S, Da = x.shape
    Tc = act_chunk_len
    assert S % Tc == 0, "sequence length must be divisible by act_chunk_len"
    T = S // Tc
    Din = Tc * Da
    out_dtype = x.dtype

    w1 = params["w1"].astype(jnp.bfloat16)
    w2 = params["w2"].astype(jnp.bfloat16)
    H = w1.shape[1]
    Dout = w2.shape[1]

    # Defensive reshape: accept (H,) or (1, H) parameter vectors.
    b1 = jnp.asarray(params["b1"]).reshape(1, H)
    gamma = jnp.asarray(params["gamma"]).reshape(1, H)
    beta = jnp.asarray(params["beta"]).reshape(1, H)
    bgb = jnp.concatenate([b1, gamma, beta], axis=0).astype(jnp.float32)
    b2 = jnp.asarray(params["b2"]).reshape(1, Dout).astype(jnp.float32)

    # Glue: 'B (T Tc) Da -> B T (Tc Da)' then flatten rows -> (M, Din) slab.
    # Pure metadata reshape on contiguous memory; x keeps its dtype (no extra
    # wrapper-side cast / HBM pass).
    x2d = x.reshape(B * T, Din)
    M = B * T

    # Row tiling: big tiles amortize per-grid-step overhead; TM multiple of 8.
    TM = min(row_tile, _round_up(M, 8))
    M_pad = _round_up(M, TM)
    if M_pad != M:
        x2d = jnp.pad(x2d, ((0, M_pad - M), (0, 0)))
    grid = (M_pad // TM,)

    # Explicit VMEM budget: double-buffered x / out tiles + resident weights,
    # 2x headroom, capped at 32 MiB (safe within v7x's 64 MiB physical VMEM).
    x_bytes = jnp.dtype(x.dtype).itemsize
    out_bytes = jnp.dtype(out_dtype).itemsize
    vmem_bytes = (2 * TM * Din * x_bytes + 2 * TM * Dout * out_bytes
                  + 2 * (Din * H * 2 + H * Dout * 2 + 3 * H * 4 + Dout * 4))
    vmem_limit = int(min(32 * 1024 * 1024,
                         max(4 * 1024 * 1024, 2 * vmem_bytes)))

    out2d = pl.pallas_call(
        _mlp_chunk_kernel,
        out_shape=jax.ShapeDtypeStruct((M_pad, Dout), out_dtype),
        grid_spec=pltpu.PrefetchScalarGridSpec(
            num_scalar_prefetch=0,
            grid=grid,
            in_specs=[
                pl.BlockSpec((TM, Din), lambda i: (i, 0)),    # x rows (orig dtype)
                pl.BlockSpec((Din, H), lambda i: (0, 0)),     # W1 (resident)
                pl.BlockSpec((3, H), lambda i: (0, 0)),       # b1/gamma/beta
                pl.BlockSpec((H, Dout), lambda i: (0, 0)),    # W2 (resident)
                pl.BlockSpec((1, Dout), lambda i: (0, 0)),    # b2
            ],
            out_specs=pl.BlockSpec((TM, Dout), lambda i: (i, 0)),
        ),
        compiler_params=pltpu.CompilerParams(
            dimension_semantics=dimension_semantics,
            vmem_limit_bytes=vmem_limit),
    )(x2d, w1, bgb, w2, b2)

    # Only slice when rows were padded; no column slice (output is unpadded).
    if M_pad != M:
        out2d = out2d[:M]
    return out2d.reshape(B, T, Dout)


# ----------------------------- references ----------------------------------

def _reference_f32(x, params, act_chunk_len):
    """Pure-f32 reference of the torch module's forward."""
    B, S, Da = x.shape
    Tc = act_chunk_len
    T = S // Tc
    x2 = x.reshape(B, T, Tc * Da).astype(jnp.float32)
    h = x2 @ params["w1"] + params["b1"].reshape(-1)
    mu = jnp.mean(h, axis=-1, keepdims=True)
    var = jnp.mean((h - mu) ** 2, axis=-1, keepdims=True)
    hn = (h - mu) / jnp.sqrt(var + LN_EPS)
    hn = hn * params["gamma"].reshape(-1) + params["beta"].reshape(-1)
    a = hn * jax.nn.sigmoid(hn)
    return a @ params["w2"] + params["b2"].reshape(-1)


def _reference_bf16(x, params, act_chunk_len):
    """Reference with the same bf16-operand / f32-accumulate matmuls as the kernel."""
    B, S, Da = x.shape
    Tc = act_chunk_len
    T = S // Tc
    x2 = x.reshape(B, T, Tc * Da).astype(jnp.bfloat16)
    w1 = params["w1"].astype(jnp.bfloat16)
    w2 = params["w2"].astype(jnp.bfloat16)
    h = jnp.dot(x2, w1, preferred_element_type=jnp.float32) + params["b1"].reshape(-1)
    mu = jnp.mean(h, axis=-1, keepdims=True)
    var = jnp.mean((h - mu) ** 2, axis=-1, keepdims=True)
    hn = (h - mu) * jax.lax.rsqrt(var + LN_EPS)
    hn = hn * params["gamma"].reshape(-1) + params["beta"].reshape(-1)
    a = hn * jax.nn.sigmoid(hn)
    out = jnp.dot(a.astype(jnp.bfloat16), w2,
                  preferred_element_type=jnp.float32) + params["b2"].reshape(-1)
    return out.astype(x.dtype)


def init_params(key, input_dim, latent_dim, hidden_dim, act_chunk_len):
    """Deterministic init mimicking torch.nn.Linear / LayerNorm defaults."""
    in_dim = input_dim * act_chunk_len
    k1, k2, k3, k4 = jax.random.split(key, 4)
    lim1 = 1.0 / jnp.sqrt(in_dim)
    lim2 = 1.0 / jnp.sqrt(hidden_dim)
    return {
        "w1": jax.random.uniform(k1, (in_dim, hidden_dim), jnp.float32,
                                 -lim1, lim1),
        "b1": jax.random.uniform(k2, (1, hidden_dim), jnp.float32,
                                 -lim1, lim1),
        "gamma": jnp.ones((1, hidden_dim), jnp.float32),
        "beta": jnp.zeros((1, hidden_dim), jnp.float32),
        "w2": jax.random.uniform(k3, (hidden_dim, latent_dim), jnp.float32,
                                 -lim2, lim2),
        "b2": jax.random.uniform(k4, (1, latent_dim), jnp.float32,
                                 -lim2, lim2),
    }


if __name__ == "__main__":
    # Small shapes consistent with the module's forward.
    B = 2            # batch
    Da = 4           # per-step action dim (input_dim)
    Tc = 10          # act_chunk_len
    T = 8            # number of chunks
    latent_dim = 16
    hidden_dim = 128

    key = jax.random.PRNGKey(0)
    kx, kp = jax.random.split(key)
    x = jax.random.normal(kx, (B, T * Tc, Da), dtype=jnp.float32)
    params = init_params(kp, Da, latent_dim, hidden_dim, Tc)

    out = mlp_chunk_act_encoder(x, params, act_chunk_len=Tc)
    out = jax.block_until_ready(out)
    assert out.shape == (B, T, latent_dim), out.shape

    # Tight check vs. the precision-matched (bf16-in / f32-acc) reference.
    ref_bf16 = _reference_bf16(x, params, act_chunk_len=Tc)
    assert jnp.allclose(out, ref_bf16, atol=1e-2, rtol=1e-2), (
        float(jnp.max(jnp.abs(out - ref_bf16))))

    # Loose sanity check vs. the pure-f32 reference (bf16 matmul rounding).
    ref_f32 = _reference_f32(x, params, act_chunk_len=Tc)
    assert jnp.allclose(out, ref_f32, atol=1e-1, rtol=1e-1), (
        float(jnp.max(jnp.abs(out - ref_f32))))

    print("KERNEL_OK")
</pallas_src>

<mosaic_0001>
module attributes {stable_mosaic.version = 11 : i64} {
  func.func @_mlp_chunk_kernel(%arg0: i32, %arg1: memref<16x40xf32, #tpu.memory_space<vmem>>, %arg2: memref<40x128xbf16, #tpu.memory_space<vmem>>, %arg3: memref<3x128xf32, #tpu.memory_space<vmem>>, %arg4: memref<128x16xbf16, #tpu.memory_space<vmem>>, %arg5: memref<1x16xf32, #tpu.memory_space<vmem>>, %arg6: memref<16x16xf32, #tpu.memory_space<vmem>>) attributes {dimension_semantics = [#tpu.dimension_semantics<parallel>], iteration_bounds = array<i64: 1>, scalar_prefetch = 0 : i64, scratch_operands = 0 : i64, tpu.core_type = #tpu.core_type<tc>, window_params = [{transform_indices = @transform_0, window_bounds = array<i64: 16, 40>}, {pipeline_mode = #tpu.pipeline_mode<synchronous>, transform_indices = @transform_1, window_bounds = array<i64: 40, 128>}, {pipeline_mode = #tpu.pipeline_mode<synchronous>, transform_indices = @transform_2, window_bounds = array<i64: 3, 128>}, {pipeline_mode = #tpu.pipeline_mode<synchronous>, transform_indices = @transform_3, window_bounds = array<i64: 128, 16>}, {pipeline_mode = #tpu.pipeline_mode<synchronous>, transform_indices = @transform_4, window_bounds = array<i64: 1, 16>}, {transform_indices = @transform_5, window_bounds = array<i64: 16, 16>}]} {
    %c0 = arith.constant 0 : index
    %c0_0 = arith.constant 0 : index
    %0 = vector.load %arg1[%c0, %c0_0] : memref<16x40xf32, #tpu.memory_space<vmem>>, vector<16x40xf32>
    %1 = arith.truncf %0 : vector<16x40xf32> to vector<16x40xbf16>
    %c0_1 = arith.constant 0 : index
    %c0_2 = arith.constant 0 : index
    %2 = vector.load %arg2[%c0_1, %c0_2] : memref<40x128xbf16, #tpu.memory_space<vmem>>, vector<40x128xbf16>
    %cst = arith.constant dense<0.000000e+00> : vector<16x128xf32>
    %3 = tpu.matmul %1, %2, %cst {dimension_numbers = #tpu.dot_dimension_numbers<[1], [0], [0], [1], [0, 0, 1, 1], [], []>} : vector<16x40xbf16>, vector<40x128xbf16>, vector<16x128xf32> -> vector<16x128xf32>
    %c0_3 = arith.constant 0 : index
    %c0_4 = arith.constant 0 : index
    %4 = vector.load %arg3[%c0_3, %c0_4] : memref<3x128xf32, #tpu.memory_space<vmem>>, vector<1x128xf32>
    %5 = vector.broadcast %4 : vector<1x128xf32> to vector<16x128xf32>
    %6 = arith.addf %3, %5 : vector<16x128xf32>
    %cst_5 = arith.constant dense<0.000000e+00> : vector<16xf32>
    %7 = vector.multi_reduction <add>, %6, %cst_5 [1] : vector<16x128xf32> to vector<16xf32>
    %8 = vector.shape_cast %7 : vector<16xf32> to vector<16x1xf32>
    %cst_6 = arith.constant 7.812500e-03 : f32
    %9 = vector.broadcast %cst_6 : f32 to vector<16x1xf32>
    %10 = arith.mulf %8, %9 : vector<16x1xf32>
    %11 = vector.broadcast %10 : vector<16x1xf32> to vector<16x128xf32>
    %12 = arith.subf %6, %11 : vector<16x128xf32>
    %13 = arith.mulf %12, %12 : vector<16x128xf32>
    %cst_7 = arith.constant dense<0.000000e+00> : vector<16xf32>
    %14 = vector.multi_reduction <add>, %13, %cst_7 [1] : vector<16x128xf32> to vector<16xf32>
    %15 = vector.shape_cast %14 : vector<16xf32> to vector<16x1xf32>
    %cst_8 = arith.constant 7.812500e-03 : f32
    %16 = vector.broadcast %cst_8 : f32 to vector<16x1xf32>
    %17 = arith.mulf %15, %16 : vector<16x1xf32>
    %cst_9 = arith.constant 9.99999974E-6 : f32
    %18 = vector.broadcast %cst_9 : f32 to vector<16x1xf32>
    %19 = arith.addf %17, %18 : vector<16x1xf32>
    %20 = math.rsqrt %19 : vector<16x1xf32>
    %21 = vector.broadcast %20 : vector<16x1xf32> to vector<16x128xf32>
    %22 = arith.mulf %12, %21 : vector<16x128xf32>
    %c1 = arith.constant 1 : index
    %c0_10 = arith.constant 0 : index
    %23 = vector.load %arg3[%c1, %c0_10] : memref<3x128xf32, #tpu.memory_space<vmem>>, vector<1x128xf32>
    %24 = vector.broadcast %23 : vector<1x128xf32> to vector<16x128xf32>
    %25 = arith.mulf %22, %24 : vector<16x128xf32>
    %c2 = arith.constant 2 : index
    %c0_11 = arith.constant 0 : index
    %26 = vector.load %arg3[%c2, %c0_11] : memref<3x128xf32, #tpu.memory_space<vmem>>, vector<1x128xf32>
    %27 = vector.broadcast %26 : vector<1x128xf32> to vector<16x128xf32>
    %28 = arith.addf %25, %27 : vector<16x128xf32>
    %29 = arith.negf %28 : vector<16x128xf32>
    %30 = math.exp %29 : vector<16x128xf32>
    %cst_12 = arith.constant 1.000000e+00 : f32
    %31 = vector.broadcast %cst_12 : f32 to vector<16x128xf32>
    %32 = arith.addf %31, %30 : vector<16x128xf32>
    %33 = arith.divf %31, %32 : vector<16x128xf32>
    %34 = arith.mulf %28, %33 : vector<16x128xf32>
    %35 = arith.truncf %34 : vector<16x128xf32> to vector<16x128xbf16>
    %c0_13 = arith.constant 0 : index
    %c0_14 = arith.constant 0 : index
    %36 = vector.load %arg4[%c0_13, %c0_14] : memref<128x16xbf16, #tpu.memory_space<vmem>>, vector<128x16xbf16>
    %cst_15 = arith.constant dense<0.000000e+00> : vector<16x16xf32>
    %37 = tpu.matmul %35, %36, %cst_15 {dimension_numbers = #tpu.dot_dimension_numbers<[1], [0], [0], [1], [0, 0, 1, 1], [], []>} : vector<16x128xbf16>, vector<128x16xbf16>, vector<16x16xf32> -> vector<16x16xf32>
    %c0_16 = arith.constant 0 : index
    %c0_17 = arith.constant 0 : index
    %38 = vector.load %arg5[%c0_16, %c0_17] : memref<1x16xf32, #tpu.memory_space<vmem>>, vector<1x16xf32>
    %39 = vector.broadcast %38 : vector<1x16xf32> to vector<16x16xf32>
    %40 = arith.addf %37, %39 : vector<16x16xf32>
    %c0_18 = arith.constant 0 : index
    %c0_19 = arith.constant 0 : index
    %41 = vector.load %arg6[%c0_18, %c0_19] : memref<16x16xf32, #tpu.memory_space<vmem>>, vector<16x16xf32>
    tpu.vector_store %arg6[%c0_18, %c0_19], %40 {strides = array<i32>} : memref<16x16xf32, #tpu.memory_space<vmem>>, vector<16x16xf32>,
    return
  }
  func.func @transform_0(%arg0: i32) -> (i32, i32) {
    %c0_i32 = arith.constant 0 : i32
    %c0_i32_0 = arith.constant 0 : i32
    return %arg0, %c0_i32 : i32, i32
  }
  func.func @transform_1(%arg0: i32) -> (i32, i32) {
    %c0_i32 = arith.constant 0 : i32
    %c0_i32_0 = arith.constant 0 : i32
    %c0_i32_1 = arith.constant 0 : i32
    return %c0_i32, %c0_i32_0 : i32, i32
  }
  func.func @transform_2(%arg0: i32) -> (i32, i32) {
    %c0_i32 = arith.constant 0 : i32
    %c0_i32_0 = arith.constant 0 : i32
    %c0_i32_1 = arith.constant 0 : i32
    return %c0_i32, %c0_i32_0 : i32, i32
  }
  func.func @transform_3(%arg0: i32) -> (i32, i32) {
    %c0_i32 = arith.constant 0 : i32
    %c0_i32_0 = arith.constant 0 : i32
    %c0_i32_1 = arith.constant 0 : i32
    return %c0_i32, %c0_i32_0 : i32, i32
  }
  func.func @transform_4(%arg0: i32) -> (i32, i32) {
    %c0_i32 = arith.constant 0 : i32
    %c0_i32_0 = arith.constant 0 : i32
    %c0_i32_1 = arith.constant 0 : i32
    return %c0_i32, %c0_i32_0 : i32, i32
  }
  func.func @transform_5(%arg0: i32) -> (i32, i32) {
    %c0_i32 = arith.constant 0 : i32
    %c0_i32_0 = arith.constant 0 : i32
    return %arg0, %c0_i32 : i32, i32
  }
}

</mosaic_0001>

<bundles_post_ra>
// kernel: tpu_custom_call.1
= control target key start
LH: loop header
LB: loop body
LE: loop exit
PB: predicated region body
PF: predicated region fallthrough
CT: control target
= control target key end

     0   :  { %vm51_vm0 = vcmask 1043456   ;;  %s446_s0 = inlined_call_operand.vmem [shape: f32[16,40], index: 0, kind: input, shape index: {}]   ;;  %s447_s1 = inlined_call_operand.vmem [shape: bf16[40,128], index: 1, kind: input, shape index: {}]   ;;  %s448_s2 = inlined_call_operand.vmem [shape: f32[3,128], index: 2, kind: input, shape index: {}]   ;;  %s449_s3 = inlined_call_operand.vmem [shape: bf16[128,16], index: 3, kind: input, shape index: {}]   ;;  %s450_s4 = inlined_call_operand.vmem [shape: f32[1,16], index: 4, kind: input, shape index: {}]   ;;  %s451_s5 = inlined_call_operand.hbm [shape: f32[16,16], index: 5, kind: output, shape index: {}]  }
   0x1   :  { %v29_v0 = vld [vmem:[%s447_s1 + $0x10] sm:$0xf] }
   0x2   :  { %v41_v1 = vunpack.c.l.b16 %v29_v0 }
   0x4   :  { %v44_v2 = vpack.c.b16 %v41_v1, %v41_v1 }
   0x5   :  { %10 = vsyncpa [#allocation3], 0  ;;  %v305_v4 = vld [vmem:[%s447_s1 + $0x8] sm:$0xff]  ;;  %v304_v5 = vld [vmem:[%s447_s1] sm:$0xff]  ;;  %vm47_vm1 = vcmask 326656   ;;  %s359_s23 = smov [#allocation2]  }
   0x6   :  { %v53_v3 = vsel %vm51_vm0, %v44_v2, 0  ;;  %v22_v6 = vld [vmem:[%s446_s0] sm:$0xff]  ;;  %v23_v7 = vld [vmem:[%s446_s0 + $0x8] sm:$0xff]  ;;  %v313_v22 = vld [vmem:[%s449_s3 + $0x38] sm:$0xff]  ;;  %vm240_vm0 = vcmask 130048   ;;  %s247_s24 = sshll.u32 %s359_s23, 4  ;;  %s248_s24 = int_to_ptr.vmem [resolvable:$true] %s247_s24 }
   0x7   :  { %60 = vmatpush.bf16.msra.mxu0 %v53_v3  ;;  %v24_v8 = vpack.c.bf16 %v23_v7, %v22_v6  ;;  %v317_v9 = vld [vmem:[%s448_s2] ss:$0 sm:$0xff]  ;;  %226 = vmatpush.bf16.msra.mxu1 %v313_v22  ;;  %v312_v25 = vld [vmem:[%s449_s3 + $0x30] sm:$0xff]  ;;  %v311_v27 = vld [vmem:[%s449_s3 + $0x28] sm:$0xff]  ;;  %s249_s27 = sshll.u32 %s451_s5, 4  ;;  %s360_s28 = smov 128   ;;  %s250_s27 = int_to_ptr.hbm [resolvable:$true] %s249_s27 }
   0x8   :  { %v310_v30 = vld [vmem:[%s449_s3 + $0x20] sm:$0xff]  ;;  %v309_v34 = vld [vmem:[%s449_s3 + $0x18] sm:$0xff]  ;;  %v308_v37 = vld [vmem:[%s449_s3 + $0x10] sm:$0xff]  ;;  %s361_s29 = smov 8  }
   0x9   :  { %v307_v42 = vld [vmem:[%s449_s3 + $0x8] sm:$0xff]  ;;  %v318_v43 = vld [vmem:[%s448_s2 + $0x1] ss:$0 sm:$0xff]  ;;  %v319_v47 = vld [vmem:[%s448_s2 + $0x2] ss:$0 sm:$0xff] }
   0xa   :  { %v306_v49 = vld [vmem:[%s449_s3] sm:$0xff] }
   0xb   :  { %61 = vmatpush.bf16.msra.mxu0 %v305_v4  ;;  %227 = vmatpush.bf16.msra.mxu1 %v312_v25 }
   0xf   :  { %62 = vmatpush.bf16.msra.mxu0 %v304_v5  ;;  %228 = vmatpush.bf16.msra.mxu1 %v311_v27 }
  0x12   :  { %269 = vmatmul.msk.bf16.vlgmr.msra.gmra.mxu0 %vm47_vm1, %v24_v8 }
  0x13   :  { %229 = vmatpush.bf16.msra.mxu1 %v310_v30 }
  0x17   :  { %230 = vmatpush.bf16.msra.mxu1 %v309_v34 }
  0x1b   :  { %231 = vmatpush.bf16.msra.mxu1 %v308_v37 }
  0x1f   :  { %232 = vmatpush.bf16.msra.mxu1 %v307_v42 }
  0x23   :  { %233 = vmatpush.bf16.msra.mxu1 %v306_v49 }
  0x8f   :  { %v64_v10 = vpop.f32.mrf.mxu0 }
  0x90   :  { %v65_v11 = vadd.f32 %v317_v9, %v64_v10 }
  0x92   :  { %69 = vadd.xlane.f32.xlu0 %v65_v11 }
  0x97   :  { %v66_v12 = vpop.f32.mrf.mxu0 }
  0x98   :  { %v67_v13 = vadd.f32 %v317_v9, %v66_v12 }
  0x9a   :  { %71 = vadd.xlane.f32.xlu0 %v67_v13 }
 0x105   :  { %v70_v14 = vpop.xlane.xlu0 %69 }
 0x106   :  { %v73_v15 = vmul.f32 0.0078125, %v70_v14 }
 0x108   :  { %v75_v16 = vsub.f32 %v65_v11, %v73_v15 }
 0x10a   :  { %v77_v17 = vmul.f32 %v75_v16, %v75_v16 }
 0x10c   :  { %79 = vadd.xlane.f32.xlu1 %v77_v17 }
 0x10d   :  { %v72_v18 = vpop.xlane.xlu0 %71 }
 0x10e   :  { %v74_v19 = vmul.f32 0.0078125, %v72_v18 }
 0x110   :  { %v76_v20 = vsub.f32 %v67_v13, %v74_v19 }
 0x112   :  { %v78_v21 = vmul.f32 %v76_v20, %v76_v20 }
 0x114   :  { %81 = vadd.xlane.f32.xlu1 %v78_v21 }
 0x17f   :  { %v80_v23 = vpop.xlane.xlu1 %79 }
 0x180   :  { %v83_v24 = vmul.f32 0.0078125, %v80_v23  ;;  %v320_v23 = vld [vmem:[%s450_s4] ss:$0 sm:$0xff] }
 0x182   :  { %v85_v26 = vadd.f32 1e-05, %v83_v24 }
 0x184   :  { %321 = vrsqrt.f32 %v85_v26  ;;  %vm93_vm3 = vweird.f32 %v85_v26 }
 0x187   :  { %v82_v28 = vpop.xlane.xlu1 %81 }
 0x188   :  { %v84_v29 = vmul.f32 0.0078125, %v82_v28 }
 0x18a   :  { %v322_v31 = vpop.eup %321  ;;  %v86_v32 = vadd.f32 1e-05, %v84_v29 }
 0x18b   :  { %v88_v33 = vmul.f32 %v322_v31, %v85_v26  ;;  %vm94_vm2 = vweird.f32 %v322_v31 }
 0x18c   :  { %323 = vrsqrt.f32 %v86_v32  ;;  %vm95_vm4 = vmor %vm93_vm3, %vm94_vm2  ;;  %vm103_vm6 = vweird.f32 %v86_v32 }
 0x18d   :  { %v89_v35 = vmul.f32 %v322_v31, %v88_v33 }
 0x18f   :  { %v90_v36 = vmul.f32 0.5, %v89_v35 }
 0x191   :  { %v91_v38 = vsub.f32 1.5, %v90_v36 }
 0x192   :  { %v324_v39 = vpop.eup %323 }
 0x193   :  { %v92_v40 = vmul.f32 %v322_v31, %v91_v38  ;;  %v98_v41 = vmul.f32 %v324_v39, %v86_v32  ;;  %vm104_vm5 = vweird.f32 %v324_v39 }
 0x194   :  { %vm105_vm7 = vmor %vm103_vm6, %vm104_vm5 }
 0x195   :  { %v96_v44 = vsel %vm95_vm4, %v322_v31, %v92_v40  ;;  %v99_v45 = vmul.f32 %v324_v39, %v98_v41 }
 0x196   :  { %v107_v46 = vmul.f32 %v96_v44, %v75_v16 }
 0x197   :  { %v100_v48 = vmul.f32 0.5, %v99_v45 }
 0x198   :  { %v111_v50 = vmul.f32 %v318_v43, %v107_v46 }
 0x199   :  { %v101_v51 = vsub.f32 1.5, %v100_v48 }
 0x19a   :  { %v115_v52 = vadd.f32 %v319_v47, %v111_v50 }
 0x19b   :  { %v102_v53 = vmul.f32 %v324_v39, %v101_v51 }
 0x19c   :  { %v270_v54 = vmul.f32 -1.442695, %v115_v52 }
 0x19d   :  { %v106_v55 = vsel %vm105_vm7, %v324_v39, %v102_v53 }
 0x19e   :  { %v108_v56 = vmul.f32 %v106_v55, %v76_v20  ;;  %325 = vpow2.f32 %v270_v54 }
 0x1a0   :  { %v112_v57 = vmul.f32 %v318_v43, %v108_v56 }
 0x1a2   :  { %v116_v58 = vadd.f32 %v319_v47, %v112_v57 }
 0x1a4   :  { %v326_v59 = vpop.eup %325  ;;  %v271_v60 = vmul.f32 -1.442695, %v116_v58 }
 0x1a5   :  { %v123_v61 = vadd.f32 1.0, %v326_v59 }
 0x1a6   :  { %327 = vpow2.f32 %v271_v60 }
 0x1a7   :  { %329 = vrcp.f32 %v123_v61  ;;  %v136_v7 = vand.u32 2147483648, %v123_v61  ;;  %vm130_vm9 = vweird.f32 %v123_v61  ;;  %v134_v8 = vand.u32 2147483647, %v123_v61 }
 0x1a9   :  { %v137_v14 = vor.u32 1.1754944e-38, %v136_v7  ;;  %vm135_vm12 = vcmp.eq.f32.partialorder %v134_v8, 8.507059e+37 }
 0x1ac   :  { %v328_v62 = vpop.eup %327 }
 0x1ad   :  { %v330_v63 = vpop.eup %329  ;;  %v124_v0 = vadd.f32 1.0, %v328_v62 }
 0x1ae   :  { %v126_v1 = vmul.f32 %v330_v63, %v123_v61  ;;  %vm131_vm8 = vweird.f32 %v330_v63 }
 0x1af   :  { %331 = vrcp.f32 %v124_v0  ;;  %vm132_vm10 = vmor %vm130_vm9, %vm131_vm8  ;;  %v151_v10 = vand.u32 2147483648, %v124_v0  ;;  %v149_v13 = vand.u32 2147483647, %v124_v0  ;;  %vm145_vm13 = vweird.f32 %v124_v0 }
 0x1b0   :  { %v127_v2 = vsub.f32 1.0, %v126_v1 }
 0x1b1   :  { %v152_v17 = vor.u32 1.1754944e-38, %v151_v10  ;;  %vm150_vm15 = vcmp.eq.f32.partialorder %v149_v13, 8.507059e+37 }
 0x1b2   :  { %v128_v3 = vmul.f32 %v330_v63, %v127_v2 }
 0x1b4   :  { %v129_v5 = vadd.f32 %v330_v63, %v128_v3 }
 0x1b5   :  { %v332_v4 = vpop.eup %331 }
 0x1b6   :  { %v141_v6 = vmul.f32 %v332_v4, %v124_v0  ;;  %v133_v11 = vsel %vm132_vm10, %v330_v63, %v129_v5  ;;  %vm146_vm11 = vweird.f32 %v332_v4 }
 0x1b7   :  { %v138_v16 = vsel %vm135_vm12, %v137_v14, %v133_v11  ;;  %vm147_vm14 = vmor %vm145_vm13, %vm146_vm11 }
 0x1b8   :  { %v142_v9 = vsub.f32 1.0, %v141_v6  ;;  %v155_v20 = vmul.f32 %v138_v16, %v115_v52 }
 0x1ba   :  { %v143_v12 = vmul.f32 %v332_v4, %v142_v9 }
 0x1bc   :  { %v144_v15 = vadd.f32 %v332_v4, %v143_v12 }
 0x1be   :  { %v148_v18 = vsel %vm147_vm14, %v332_v4, %v144_v15 }
 0x1bf   :  { %v153_v19 = vsel %vm150_vm15, %v152_v17, %v148_v18 }
 0x1c0   :  { %v156_v21 = vmul.f32 %v153_v19, %v116_v58 }
 0x1c2   :  { %v157_v22 = vpack.c.bf16 %v156_v21, %v155_v20 }
 0x1c4   :  { %234 = vmatmul.bf16.vlgmr.msra.gmra.mxu1 %v157_v22 }
 0x241   :  { %v235_v24 = vpop.f32.mrf.mxu1 }
 0x242   :  { %v236_v25 = vadd.f32 %v320_v23, %v235_v24 }
 0x244   :  { %241 = vst.msk [vmem:[#allocation2] sm:$0xff] %vm240_vm0, %v236_v25 }
 0x249   :  { %v237_v26 = vpop.f32.mrf.mxu1 }
 0x24a   :  { %v238_v27 = vadd.f32 %v320_v23, %v237_v26 }
 0x24c   :  { %242 = vst.msk [vmem:[#allocation2 + $0x8] sm:$0xff] %vm240_vm0, %v238_v27 }
 0x24d   :  { %255 = dma.vmem_to_hbm [thread:$0]  %s248_s24, 256, %s250_s27, [#allocation3], %s360_s28, %s360_s28, %s361_s29  }
 0x24e   :  { %357 = dma.done.wait [#allocation3], 256  }
 0x24f   :  { %358 = vsyncadd [#allocation3], 4294967040 }
 0x250   :  { %260 = vsyncpa [#allocation3], 1 }

</bundles_post_ra>
